<compile_context>
chip_gen: v6e
topology: v6e:2x2x1
jax: 0.10.0
libtpu: 0.0.40
codegen_flags: <defaults>
</compile_context>

<pallas_src>
import functools

import jax
import jax.numpy as jnp
from jax.experimental import pallas as pl
from jax.experimental.pallas import tpu as pltpu

OUT_DIM = 3


def _round_up(x, m):
    return ((x + m - 1) // m) * m


def mlp_kernel(x_ref, w_ref, b_ref, o_ref):
    # Single fused affine map (layer1 ∘ layer2 ∘ layer3) + sigmoid, all f32.
    h = jnp.dot(x_ref[...], w_ref[...], preferred_element_type=jnp.float32)
    o_ref[...] = jax.nn.sigmoid(h + b_ref[...]).astype(o_ref.dtype)


def prepare_params(params):
    """One-time fold of the three Linear layers into a single affine map (f32).

    Exact in real arithmetic (no activation between the layers); done once so
    the per-call path carries no weight-prep ops.
    """
    w1, b1 = params["w1"], params["b1"]
    w2, b2 = params["w2"], params["b2"]
    w3, b3 = params["w3"], params["b3"]
    w = (w1 @ w2) @ w3                     # (input_size, 3)
    b = ((b1 @ w2) + b2) @ w3 + b3         # (1, 3)
    return {"w": w, "b": b}


def _pick_tile(batch, tm):
    """Batch tile: multiple of 8 sublanes (or the full batch), large enough to
    amortize per-step overhead, and chosen so the grid has >= 2 'parallel'
    steps whenever the batch permits (both v7x TensorCores get work)."""
    if batch <= 16:
        return batch                          # single full block (always legal)
    if batch <= tm:
        return _round_up(-(-batch // 2), 8)   # ceil(batch/2), 8-aligned -> grid of 2
    return max(8, (tm // 8) * 8)


@functools.partial(jax.jit, static_argnames=("tm",))
def mlp_forward(x, prepared, tm=4096):
    """x: (batch, input_size) f32. prepared: output of prepare_params()."""
    batch, input_size = x.shape
    w, b = prepared["w"], prepared["b"]
    out_dim = w.shape[1]

    tile = _pick_tile(batch, tm)
    grid = (pl.cdiv(batch, tile),)

    def resident(shape):
        # Same block index every grid step -> stays VMEM-resident.
        return pl.BlockSpec(shape, lambda i: (0, 0))

    return pl.pallas_call(
        mlp_kernel,
        out_shape=jax.ShapeDtypeStruct((batch, out_dim), jnp.float32),
        grid=grid,
        in_specs=[
            pl.BlockSpec((tile, input_size), lambda i: (i, 0)),  # x tile (pipelined)
            resident((input_size, out_dim)),                     # folded W
            resident((1, out_dim)),                              # folded b
        ],
        # Narrow, lane-masked but byte-minimal output block; partial last
        # block (when tile doesn't divide batch) is masked by Pallas.
        out_specs=pl.BlockSpec((tile, out_dim), lambda i: (i, 0)),
        compiler_params=pltpu.CompilerParams(
            dimension_semantics=("parallel",)),
    )(x, w, b)


def init_params(key, input_size, hidden1_size, hidden2_size, out_size=OUT_DIM):
    """Deterministic synthetic init (Kaiming-uniform-like bounds, like nn.Linear)."""
    ks = jax.random.split(key, 6)

    def linear_init(kw, kb, fan_in, fan_out):
        bound = 1.0 / jnp.sqrt(jnp.float32(fan_in))
        w = jax.random.uniform(kw, (fan_in, fan_out), jnp.float32, -bound, bound)
        b = jax.random.uniform(kb, (1, fan_out), jnp.float32, -bound, bound)
        return w, b

    w1, b1 = linear_init(ks[0], ks[1], input_size, hidden1_size)
    w2, b2 = linear_init(ks[2], ks[3], hidden1_size, hidden2_size)
    w3, b3 = linear_init(ks[4], ks[5], hidden2_size, out_size)
    return {"w1": w1, "b1": b1, "w2": w2, "b2": b2, "w3": w3, "b3": b3}


if __name__ == "__main__":
    key = jax.random.PRNGKey(0)
    k_x, k_p = jax.random.split(key)

    batch = 200            # not a multiple of the tile: exercises the masked last block
    input_size = 32
    hidden1_size = 64
    hidden2_size = 32

    x = jax.random.normal(k_x, (batch, input_size), dtype=jnp.float32)
    params = init_params(k_p, input_size, hidden1_size, hidden2_size)
    prepared = prepare_params(params)      # one-time weight fold (hoisted)

    out = mlp_forward(x, prepared)         # tile=104 -> grid=(2,) over the batch
    out = jax.block_until_ready(out)

    # Pure-JAX f32 reference: sequential three Linear layers + sigmoid.
    ref = x @ params["w1"] + params["b1"]
    ref = ref @ params["w2"] + params["b2"]
    ref = ref @ params["w3"] + params["b3"]
    ref = jax.nn.sigmoid(ref)

    assert out.shape == (batch, OUT_DIM)
    max_err = float(jnp.max(jnp.abs(out - ref)))
    # Everything is f32 (folded weights vs sequential), so tolerance is tight.
    assert jnp.allclose(out, ref, atol=1e-4, rtol=1e-4), max_err

    print("KERNEL_OK")
</pallas_src>

<mosaic_0001>
module attributes {stable_mosaic.version = 11 : i64} {
  func.func @mlp_kernel(%arg0: i32, %arg1: memref<104x32xf32, #tpu.memory_space<vmem>>, %arg2: memref<32x3xf32, #tpu.memory_space<vmem>>, %arg3: memref<1x3xf32, #tpu.memory_space<vmem>>, %arg4: memref<104x3xf32, #tpu.memory_space<vmem>>) attributes {dimension_semantics = [#tpu.dimension_semantics<parallel>], iteration_bounds = array<i64: 2>, scalar_prefetch = 0 : i64, scratch_operands = 0 : i64, tpu.core_type = #tpu.core_type<tc>, window_params = [{transform_indices = @transform_0, window_bounds = array<i64: 104, 32>}, {pipeline_mode = #tpu.pipeline_mode<synchronous>, transform_indices = @transform_1, window_bounds = array<i64: 32, 3>}, {pipeline_mode = #tpu.pipeline_mode<synchronous>, transform_indices = @transform_2, window_bounds = array<i64: 1, 3>}, {transform_indices = @transform_3, window_bounds = array<i64: 104, 3>}]} {
    %c0 = arith.constant 0 : index
    %c0_0 = arith.constant 0 : index
    %0 = vector.load %arg1[%c0, %c0_0] : memref<104x32xf32, #tpu.memory_space<vmem>>, vector<104x32xf32>
    %c0_1 = arith.constant 0 : index
    %c0_2 = arith.constant 0 : index
    %1 = vector.load %arg2[%c0_1, %c0_2] : memref<32x3xf32, #tpu.memory_space<vmem>>, vector<32x3xf32>
    %cst = arith.constant dense<0.000000e+00> : vector<104x3xf32>
    %2 = tpu.matmul %0, %1, %cst {dimension_numbers = #tpu.dot_dimension_numbers<[1], [0], [0], [1], [0, 0, 1, 1], [], []>} : vector<104x32xf32>, vector<32x3xf32>, vector<104x3xf32> -> vector<104x3xf32>
    %c0_3 = arith.constant 0 : index
    %c0_4 = arith.constant 0 : index
    %3 = vector.load %arg3[%c0_3, %c0_4] : memref<1x3xf32, #tpu.memory_space<vmem>>, vector<1x3xf32>
    %4 = vector.broadcast %3 : vector<1x3xf32> to vector<104x3xf32>
    %5 = arith.addf %2, %4 : vector<104x3xf32>
    %6 = arith.negf %5 : vector<104x3xf32>
    %7 = math.exp %6 : vector<104x3xf32>
    %cst_5 = arith.constant 1.000000e+00 : f32
    %8 = vector.broadcast %cst_5 : f32 to vector<104x3xf32>
    %9 = arith.addf %8, %7 : vector<104x3xf32>
    %10 = arith.divf %8, %9 : vector<104x3xf32>
    %c0_6 = arith.constant 0 : index
    %c0_7 = arith.constant 0 : index
    %11 = vector.load %arg4[%c0_6, %c0_7] : memref<104x3xf32, #tpu.memory_space<vmem>>, vector<104x3xf32>
    tpu.vector_store %arg4[%c0_6, %c0_7], %10 {strides = array<i32>} : memref<104x3xf32, #tpu.memory_space<vmem>>, vector<104x3xf32>,
    return
  }
  func.func @transform_0(%arg0: i32) -> (i32, i32) {
    %c0_i32 = arith.constant 0 : i32
    %c0_i32_0 = arith.constant 0 : i32
    return %arg0, %c0_i32 : i32, i32
  }
  func.func @transform_1(%arg0: i32) -> (i32, i32) {
    %c0_i32 = arith.constant 0 : i32
    %c0_i32_0 = arith.constant 0 : i32
    %c0_i32_1 = arith.constant 0 : i32
    return %c0_i32, %c0_i32_0 : i32, i32
  }
  func.func @transform_2(%arg0: i32) -> (i32, i32) {
    %c0_i32 = arith.constant 0 : i32
    %c0_i32_0 = arith.constant 0 : i32
    %c0_i32_1 = arith.constant 0 : i32
    return %c0_i32, %c0_i32_0 : i32, i32
  }
  func.func @transform_3(%arg0: i32) -> (i32, i32) {
    %c0_i32 = arith.constant 0 : i32
    %c0_i32_0 = arith.constant 0 : i32
    return %arg0, %c0_i32 : i32, i32
  }
}

</mosaic_0001>

<bundles_post_ra>
// kernel: mlp_forward.1
= control target key start
LH: loop header
LB: loop body
LE: loop exit
PB: predicated region body
PF: predicated region fallthrough
CT: control target
= control target key end

     0   :  { %s1119_s12 = smov 0   ;;  %s1121_s13 = smov 0   ;;  %s1345_s0 = inlined_call_operand.vmem [shape: f32[200,32], index: 0, kind: input, shape index: {}]   ;;  %s1346_s1 = inlined_call_operand.vmem [shape: f32[32,3], index: 1, kind: input, shape index: {}]   ;;  %s1347_s2 = inlined_call_operand.vmem [shape: f32[1,3], index: 2, kind: input, shape index: {}]   ;;  %s1348_s3 = inlined_call_operand.vmem [shape: f32[200,3], index: 3, kind: output, shape index: {}]  }
   0x1   :  { %s1123_s14 = smov 0  }
   0x2 LB: > { %s1132_s15 = sadd.s32 4294967295, %s1063_s14   ;;  %s1134_s16 = sadd.s32 1, %s1063_s14   ;;  %s1063_s14 = sphi %s1123_s14, %s1355_s14   ;;  %s1059_s13 = sphi %s1121_s13, %s1354_s13   ;;  %s1055_s12 = sphi %s1119_s12, %s1353_s12  }
   0x3   : > { %s85_s17 = ssub.s32 %s1063_s14, %s1134_s16  ;;  %s88_s18 = sadd.s32 1, %s1059_s13 }
   0x4   : > { %p86_p0 = scmp.eq.s32.totalorder %s85_s17, 0  ;;  %p98_p1 = scmp.ne.s32.totalorder %s1059_s13, %s1055_s12 }
   0x5   : > { %p99_p2 = scmp.eq.s32.totalorder %s1132_s15, 1  ;;  %p747_p3 = scmp.ge.s32.totalorder %s1063_s14, 1 }
   0x6   : > { %s1142_s19 = scalar_select %p86_p0, %s1059_s13, %s88_s18  }
   0x7   : > { %p1144_p4 = por %p99_p2, %p98_p1  ;;  %p146_p5 = scmp.lt.s32.totalorder %s1063_s14, 3 }
   0x9   : > { %p147_p6 = pnand %p747_p3, %p146_p5 }
   0xa   : > { %s1152_s23 = smul.u32 (!%p147_p6), 13, %s1132_s15  ;;  %s170_s10 = sand.u32 (!%p147_p6), 1, %s1055_s12  }
   0xb   : > { %150 = sbr.rel (%p147_p6) target bundleno = 331 (0x14b), region = 32 }
   0xc   : > { %p178_p7 = scmp.lt.s32.totalorder (!%p147_p6), %s1152_s23, 24  ;;  %s861_s11 = smul.u32 (!%p147_p6), 104, %s170_s10 }
   0xe   : > { %s1228_s12 = scalar_lea.vmem (!%p147_p6), [#allocation2], %s861_s11  }
  0x10   : > { %v208_v0 = vld [vmem:[%s1346_s1 + $0x18] sm:$0xff]  ;;  %v1097_v1 = vmov 0.0   ;;  %v207_v2 = vld [vmem:[%s1346_s1 + $0x10] sm:$0xff]  ;;  %v206_v3 = vld [vmem:[%s1346_s1 + $0x8] sm:$0xff]  ;;  %s179_s28 = scalar_select %p178_p7, %s1152_s23, 24  ;;  %vm216_vm0 = vcmask 261120  }
  0x11   : > { %806 = vmatprep.subr.mxu0 %v1097_v1  ;;  %853 = vmatprep.subr.mxu1 %v1097_v1  ;;  %v205_v4 = vld [vmem:[%s1346_s1] sm:$0xff]  ;;  %vm1098_vm1 = vmmov 0   ;;  %vm464_vm2 = vcmask 23552   ;;  %s486_s14 = ssub.s32 (%p1144_p4), 25, %s1152_s23  ;;  %s788_s17 = smul.u32 (%p1144_p4), 104, %s1132_s15 }
  0x12   : > { %807 = vmatpush3.msra.mxu0 %v208_v0  ;;  %857 = vmatpush3.msra.mxu1 %v208_v0  ;;  %s748_s4 = sshll.u32 %s179_s28, 3  ;;  %v1212_v18 = vld [vmem:[%s1347_s2] ss:$0 sm:$0xff]  ;;  %p487_p8 = scmp.lt.s32.totalorder (%p1144_p4), %s486_s14, 13 }
  0x13   : > { %808 = vmatprep.subr.mxu0 %v1097_v1  ;;  %854 = vmatprep.subr.mxu1 %v1097_v1  ;;  %s1169_s7 = scalar_lea.vmem %s1345_s0, %s748_s4  ;;  %s1263_s22 = scalar_lea.vmem (%p1144_p4), %s1348_s3, %s788_s17  }
  0x14   : > { %809 = vmatpush3.msra.mxu0 %v207_v2  ;;  %858 = vmatpush3.msra.mxu1 %v207_v2  ;;  %v192_v5 = vld [vmem:[%s1169_s7] sm:$0xff]  ;;  %v199_v6 = vld [vmem:[%s1169_s7 + $0x38] sm:$0xff]  ;;  %v193_v7 = vld [vmem:[%s1169_s7 + $0x8] sm:$0xff] }
  0x15   : > { %810 = vmatprep.subr.mxu0 %v1097_v1  ;;  %855 = vmatprep.subr.mxu1 %v1097_v1  ;;  %v200_v8 = vld [vmem:[%s1169_s7 + $0x40] sm:$0xff]  ;;  %v194_v9 = vld [vmem:[%s1169_s7 + $0x10] sm:$0xff]  ;;  %v201_v10 = vld [vmem:[%s1169_s7 + $0x48] sm:$0xff] }
  0x16   : > { %811 = vmatpush3.msra.mxu0 %v206_v3  ;;  %859 = vmatpush3.msra.mxu1 %v206_v3  ;;  %v195_v11 = vld [vmem:[%s1169_s7 + $0x18] sm:$0xff]  ;;  %v202_v12 = vld [vmem:[%s1169_s7 + $0x50] sm:$0xff]  ;;  %v196_v13 = vld [vmem:[%s1169_s7 + $0x20] sm:$0xff] }
  0x17   : > { %812 = vmatprep.subr.mxu0 %v1097_v1  ;;  %814 = vmatprep.mubr.msk.f32.mxu0 %vm1098_vm1, %v1097_v1  ;;  %v203_v14 = vld [vmem:[%s1169_s7 + $0x58] sm:$0xff]  ;;  %v197_v15 = vld [vmem:[%s1169_s7 + $0x28] sm:$0xff]  ;;  %v204_v16 = vld [vmem:[%s1169_s7 + $0x60] sm:$0xff] }
  0x18   : > { %813 = vmatpush3.msra.mxu0 %v205_v4  ;;  %856 = vmatprep.subr.mxu1 %v1097_v1  ;;  %v198_v17 = vld [vmem:[%s1169_s7 + $0x30] sm:$0xff] }
  0x19   : > { %815 = vmatmul.mubr.msk.f32.vlgmr.msra.gmra.mxu0 %vm216_vm0, %v192_v5  ;;  %860 = vmatpush3.msra.mxu1 %v205_v4 }
  0x1a   : > { %835 = vmatprep.mubr.msk.f32.mxu1 %vm1098_vm1, %v1097_v1  ;;  %817 = vmatprep.mubr.msk.f32.mxu0 %vm1098_vm1, %v1097_v1 }
  0x1b   : > { %836 = vmatmul.mubr.msk.f32.vlgmr.msra.gmra.mxu1 %vm216_vm0, %v199_v6 }
  0x1c   : > { %838 = vmatprep.mubr.msk.f32.mxu1 %vm1098_vm1, %v1097_v1 }
  0x1d   : > { %818 = vmatmul.mubr.msk.f32.gmra.mxu0 %vm216_vm0, %v193_v7 }
  0x1e   : > { %820 = vmatprep.mubr.msk.f32.mxu0 %vm1098_vm1, %v1097_v1 }
  0x1f   : > { %839 = vmatmul.mubr.msk.f32.gmra.mxu1 %vm216_vm0, %v200_v8 }
  0x20   : > { %841 = vmatprep.mubr.msk.f32.mxu1 %vm1098_vm1, %v1097_v1 }
  0x21   : > { %821 = vmatmul.mubr.msk.f32.gmra.mxu0 %vm216_vm0, %v194_v9 }
  0x22   : > { %823 = vmatprep.mubr.msk.f32.mxu0 %vm1098_vm1, %v1097_v1 }
  0x23   : > { %842 = vmatmul.mubr.msk.f32.gmra.mxu1 %vm216_vm0, %v201_v10 }
  0x24   : > { %844 = vmatprep.mubr.msk.f32.mxu1 %vm1098_vm1, %v1097_v1 }
  0x25   : > { %824 = vmatmul.mubr.msk.f32.gmra.mxu0 %vm216_vm0, %v195_v11 }
  0x26   : > { %826 = vmatprep.mubr.msk.f32.mxu0 %vm1098_vm1, %v1097_v1 }
  0x27   : > { %845 = vmatmul.mubr.msk.f32.gmra.mxu1 %vm216_vm0, %v202_v12 }
  0x28   : > { %847 = vmatprep.mubr.msk.f32.mxu1 %vm1098_vm1, %v1097_v1 }
  0x29   : > { %827 = vmatmul.mubr.msk.f32.gmra.mxu0 %vm216_vm0, %v196_v13 }
  0x2a   : > { %829 = vmatprep.mubr.msk.f32.mxu0 %vm1098_vm1, %v1097_v1 }
  0x2b   : > { %848 = vmatmul.mubr.msk.f32.gmra.mxu1 %vm216_vm0, %v203_v14 }
  0x2c   : > { %850 = vmatprep.mubr.msk.f32.mxu1 %vm1098_vm1, %v1097_v1 }
  0x2d   : > { %830 = vmatmul.mubr.msk.f32.gmra.mxu0 %vm216_vm0, %v197_v15 }
  0x2e   : > { %832 = vmatprep.mubr.msk.f32.mxu0 %vm1098_vm1, %v1097_v1 }
  0x2f   : > { %851 = vmatmul.mubr.msk.f32.gmra.mxu1 %vm216_vm0, %v204_v16 }
  0x31   : > { %833 = vmatmul.mubr.msk.f32.gmra.mxu0 %vm216_vm0, %v198_v17 }
  0xd9   : > { %v322_v19 = vpop.f32.mrf.mxu0 }
  0xda   : > { %v323_v20 = vadd.f32 %v1212_v18, %v322_v19 }
  0xdb   : > { %v816_v21 = vpop.f32.mrf.mxu0  ;;  %v357_v22 = vpop.f32.mrf.mxu1 }
  0xdc   : > { %v763_v23 = vmul.f32 -1.442695, %v323_v20  ;;  %v358_v24 = vadd.f32 %v1212_v18, %v357_v22 }
  0xdd   : > { %v327_v25 = vpop.f32.mrf.mxu0  ;;  %v837_v26 = vpop.f32.mrf.mxu1 }
  0xde   : > { %953 = vpow2.f32 %v763_v23  ;;  %v770_v27 = vmul.f32 -1.442695, %v358_v24  ;;  %v328_v28 = vadd.f32 %v1212_v18, %v327_v25 }
  0xdf   : > { %v819_v29 = vpop.f32.mrf.mxu0  ;;  %v362_v30 = vpop.f32.mrf.mxu1 }
  0xe0   : > { %955 = vpow2.f32 %v770_v27  ;;  %v764_v31 = vmul.f32 -1.442695, %v328_v28  ;;  %v363_v32 = vadd.f32 %v1212_v18, %v362_v30 }
  0xe1   : > { %v332_v33 = vpop.f32.mrf.mxu0  ;;  %v840_v34 = vpop.f32.mrf.mxu1 }
  0xe2   : > { %957 = vpow2.f32 %v764_v31  ;;  %v771_v35 = vmul.f32 -1.442695, %v363_v32  ;;  %v333_v36 = vadd.f32 %v1212_v18, %v332_v33 }
  0xe3   : > { %v822_v37 = vpop.f32.mrf.mxu0  ;;  %v367_v38 = vpop.f32.mrf.mxu1 }
  0xe4   : > { %959 = vpow2.f32 %v771_v35  ;;  %v765_v39 = vmul.f32 -1.442695, %v333_v36  ;;  %v368_v40 = vadd.f32 %v1212_v18, %v367_v38 }
  0xe5   : > { %v337_v41 = vpop.f32.mrf.mxu0  ;;  %v843_v42 = vpop.f32.mrf.mxu1 }
  0xe6   : > { %961 = vpow2.f32 %v765_v39  ;;  %v772_v43 = vmul.f32 -1.442695, %v368_v40  ;;  %v338_v44 = vadd.f32 %v1212_v18, %v337_v41 }
  0xe7   : > { %v825_v45 = vpop.f32.mrf.mxu0  ;;  %v372_v46 = vpop.f32.mrf.mxu1 }
  0xe8   : > { %963 = vpow2.f32 %v772_v43  ;;  %v766_v47 = vmul.f32 -1.442695, %v338_v44  ;;  %v373_v48 = vadd.f32 %v1212_v18, %v372_v46 }
  0xe9   : > { %v342_v49 = vpop.f32.mrf.mxu0  ;;  %v846_v50 = vpop.f32.mrf.mxu1 }
  0xea   : > { %965 = vpow2.f32 %v766_v47  ;;  %v773_v51 = vmul.f32 -1.442695, %v373_v48  ;;  %v343_v52 = vadd.f32 %v1212_v18, %v342_v49 }
  0xeb   : > { %v954_v53 = vpop.eup %953  ;;  %v828_v54 = vpop.f32.mrf.mxu0 }
  0xec   : > { %v377_v55 = vpop.f32.mrf.mxu1  ;;  %v425_v56 = vadd.f32 1.0, %v954_v53  ;;  %967 = vpow2.f32 %v773_v51  ;;  %v767_v57 = vmul.f32 -1.442695, %v343_v52 }
  0xed   : > { %v378_v58 = vadd.f32 %v1212_v18, %v377_v55  ;;  %v956_v59 = vpop.eup %955  ;;  %v347_v60 = vpop.f32.mrf.mxu0 }
  0xee   : > { %v849_v61 = vpop.f32.mrf.mxu1  ;;  %969 = vrcp.f32 %v425_v56  ;;  %v432_v62 = vadd.f32 1.0, %v956_v59  ;;  %v348_v0 = vadd.f32 %v1212_v18, %v347_v60 }
  0xef   : > { %v774_v63 = vmul.f32 -1.442695, %v378_v58  ;;  %v958_v1 = vpop.eup %957  ;;  %971 = vpow2.f32 %v767_v57  ;;  %v831_v2 = vpop.f32.mrf.mxu0 }
  0xf0   : > { %v382_v3 = vpop.f32.mrf.mxu1  ;;  %973 = vrcp.f32 %v432_v62  ;;  %v426_v4 = vadd.f32 1.0, %v958_v1  ;;  %v768_v5 = vmul.f32 -1.442695, %v348_v0 }
  0xf1   : > { %v383_v6 = vadd.f32 %v1212_v18, %v382_v3  ;;  %v960_v7 = vpop.eup %959  ;;  %975 = vpow2.f32 %v774_v63  ;;  %v352_v8 = vpop.f32.mrf.mxu0 }
  0xf2   : > { %v852_v9 = vpop.f32.mrf.mxu1  ;;  %977 = vrcp.f32 %v426_v4  ;;  %v433_v10 = vadd.f32 1.0, %v960_v7  ;;  %v353_v12 = vadd.f32 %v1212_v18, %v352_v8 }
  0xf3   : > { %v775_v11 = vmul.f32 -1.442695, %v383_v6  ;;  %v962_v13 = vpop.eup %961  ;;  %979 = vpow2.f32 %v768_v5  ;;  %v834_v14 = vpop.f32.mrf.mxu0 }
  0xf4   : > { %981 = vrcp.f32 %v433_v10  ;;  %v427_v15 = vadd.f32 1.0, %v962_v13  ;;  %v769_v16 = vmul.f32 -1.442695, %v353_v12 }
  0xf5   : > { %v964_v17 = vpop.eup %963  ;;  %983 = vpow2.f32 %v775_v11 }
  0xf6   : > { %985 = vrcp.f32 %v427_v15  ;;  %v434_v19 = vadd.f32 1.0, %v964_v17 }
  0xf7   : > { %v966_v20 = vpop.eup %965  ;;  %987 = vpow2.f32 %v769_v16 }
  0xf8   : > { %989 = vrcp.f32 %v434_v19  ;;  %v428_v21 = vadd.f32 1.0, %v966_v20 }
  0xf9   : > { %v968_v22 = vpop.eup %967 }
  0xfa   : > { %991 = vrcp.f32 %v428_v21  ;;  %v435_v23 = vadd.f32 1.0, %v968_v22 }
  0xfb   : > { %v970_v18 = vpop.eup %969 }
  0xfc   : > { %v972_v24 = vpop.eup %971  ;;  %465 = vst.msk [vmem:[%s1228_s12] sm:$0xff] %vm464_vm2, %v970_v18  ;;  %993 = vrcp.f32 %v435_v23 }
  0xfd   : > { %v974_v25 = vpop.eup %973  ;;  %v429_v26 = vadd.f32 1.0, %v972_v24 }
  0xfe   : > { %v976_v27 = vpop.eup %975  ;;  %472 = vst.msk [vmem:[%s1228_s12 + $0x38] sm:$0xff] %vm464_vm2, %v974_v25 }
  0xff   : > { %v978_v28 = vpop.eup %977  ;;  %995 = vrcp.f32 %v429_v26  ;;  %v436_v29 = vadd.f32 1.0, %v976_v27 }
 0x100   : > { %v980_v30 = vpop.eup %979  ;;  %466 = vst.msk [vmem:[%s1228_s12 + $0x8] sm:$0xff] %vm464_vm2, %v978_v28 }
 0x101   : > { %v982_v31 = vpop.eup %981  ;;  %997 = vrcp.f32 %v436_v29  ;;  %v430_v32 = vadd.f32 1.0, %v980_v30 }
 0x102   : > { %v984_v33 = vpop.eup %983  ;;  %473 = vst.msk [vmem:[%s1228_s12 + $0x40] sm:$0xff] %vm464_vm2, %v982_v31 }
 0x103   : > { %v986_v34 = vpop.eup %985  ;;  %999 = vrcp.f32 %v430_v32  ;;  %v437_v35 = vadd.f32 1.0, %v984_v33 }
 0x104   : > { %v988_v36 = vpop.eup %987  ;;  %467 = vst.msk [vmem:[%s1228_s12 + $0x10] sm:$0xff] %vm464_vm2, %v986_v34 }
 0x105   : > { %v990_v37 = vpop.eup %989  ;;  %1001 = vrcp.f32 %v437_v35  ;;  %v431_v38 = vadd.f32 1.0, %v988_v36 }
 0x106   : > { %474 = vst.msk [vmem:[%s1228_s12 + $0x48] sm:$0xff] %vm464_vm2, %v990_v37 }
 0x107   : > { %v992_v39 = vpop.eup %991  ;;  %1003 = vrcp.f32 %v431_v38 }
 0x108   : > { %468 = vst.msk [vmem:[%s1228_s12 + $0x18] sm:$0xff] %vm464_vm2, %v992_v39 }
 0x109   : > { %v994_v40 = vpop.eup %993 }
 0x10a   : > { %475 = vst.msk [vmem:[%s1228_s12 + $0x50] sm:$0xff] %vm464_vm2, %v994_v40 }
 0x10c   : > { %v996_v41 = vpop.eup %995 }
 0x10d   : > { %469 = vst.msk [vmem:[%s1228_s12 + $0x20] sm:$0xff] %vm464_vm2, %v996_v41 }
 0x10e   : > { %v998_v42 = vpop.eup %997 }
 0x10f   : > { %476 = vst.msk [vmem:[%s1228_s12 + $0x58] sm:$0xff] %vm464_vm2, %v998_v42 }
 0x110   : > { %v1000_v43 = vpop.eup %999 }
 0x111   : > { %470 = vst.msk [vmem:[%s1228_s12 + $0x28] sm:$0xff] %vm464_vm2, %v1000_v43  ;;  %484 = sbr.rel (!%p1144_p4) target bundleno = 331 (0x14b), region = 36 }
 0x112   : > { %v1002_v44 = vpop.eup %1001 }
 0x113   : > { %477 = vst.msk [vmem:[%s1228_s12 + $0x60] sm:$0xff] %vm464_vm2, %v1002_v44 }
 0x114   : > { %v1004_v45 = vpop.eup %1003 }
 0x115   : > { %471 = vst.msk [vmem:[%s1228_s12 + $0x30] sm:$0xff] %vm464_vm2, %v1004_v45 }
 0x116   : > { %s1357_s14 = smov (!%p487_p8, %s486_s14), 13 }
 0x117   : > { %s776_s24 = sshll.u32 %s1357_s14, 7 }
 0x118   : > { %p779_p9 = scmp.eq.s32.totalorder %s776_s24, 0 }
 0x119   : > { %1005 = sdivrem.u32 (!%p779_p9), %s1357_s14, 13 }
 0x11a   : > { %495 = sbr.rel (%p779_p9) target bundleno = 331 (0x14b), region = 40 }
 0x122   : > { %s1269_s20 = spop.drf %1005 }
 0x123   : > { %p780_p10 = scmp.le.s32.totalorder %s1269_s20, 0 }
 0x124   : > { %s1350_s15 = smov (!%p780_p10), %s1263_s22  ;;  %s1351_s23 = smov (!%p780_p10), %s1228_s12 }
 0x125   : > { %700 = sbr.rel (%p780_p10) target bundleno = 306 (0x132), region = 116  ;;  %s1278_s25 = smov (!%p780_p10), 0  }
 0x126   : > { %s1280_s26 = smov (!%p780_p10), 0  }
 0x12a LB: >> { %v584_v46 = vld [vmem:[%s1071_s23] sm:$0xff]  ;;  %v586_v47 = vld [vmem:[%s1071_s23 + $0x8] sm:$0xff]  ;;  %v588_v48 = vld [vmem:[%s1071_s23 + $0x10] sm:$0xff]  ;;  %s610_s27 = sadd.s32 1, %s1075_s25  ;;  %s578_s26 = sadd.s32 1, %s1079_s26   ;;  %s1079_s26 = sphi %s1280_s26, %s578_s26   ;;  %s1075_s25 = sphi %s1278_s25, %s1352_s25   ;;  %s1071_s23 = sphi %s1351_s23, %s615_s23   ;;  %s1067_s15 = sphi %s1350_s15, %s616_s15  }
 0x12b   : >> { %585 = vst [vmem:[%s1067_s15] sm:$0xff] %v584_v46  ;;  %587 = vst [vmem:[%s1067_s15 + $0x8] sm:$0xff] %v586_v47  ;;  %v590_v49 = vld [vmem:[%s1071_s23 + $0x18] sm:$0xff]  ;;  %v592_v50 = vld [vmem:[%s1071_s23 + $0x20] sm:$0xff]  ;;  %p611_p11 = scmp.ge.s32.totalorder %s610_s27, %s1269_s20  ;;  %p577_p12 = scmp.ge.s32.totalorder %s578_s26, %s1269_s20 }
 0x12c   : >> { %589 = vst [vmem:[%s1067_s15 + $0x10] sm:$0xff] %v588_v48  ;;  %v594_v51 = vld [vmem:[%s1071_s23 + $0x28] sm:$0xff]  ;;  %591 = vst [vmem:[%s1067_s15 + $0x18] sm:$0xff] %v590_v49  ;;  %v596_v52 = vld [vmem:[%s1071_s23 + $0x30] sm:$0xff] }
 0x12d   : >> { %593 = vst [vmem:[%s1067_s15 + $0x20] sm:$0xff] %v592_v50  ;;  %595 = vst [vmem:[%s1067_s15 + $0x28] sm:$0xff] %v594_v51  ;;  %v598_v53 = vld [vmem:[%s1071_s23 + $0x38] sm:$0xff]  ;;  %v600_v54 = vld [vmem:[%s1071_s23 + $0x40] sm:$0xff]  ;;  %s1359_s27 = smov (%p611_p11, %s610_s27), 0  ;;  %580 = sbr.rel (!%p577_p12) target bundleno = 298 (0x12a), region = 122 }
 0x12e   : >> { %597 = vst [vmem:[%s1067_s15 + $0x30] sm:$0xff] %v596_v52  ;;  %599 = vst [vmem:[%s1067_s15 + $0x38] sm:$0xff] %v598_v53  ;;  %v602_v55 = vld [vmem:[%s1071_s23 + $0x48] sm:$0xff]  ;;  %v604_v56 = vld [vmem:[%s1071_s23 + $0x50] sm:$0xff]  ;;  %s613_s28 = smul.u32 104, %s1359_s27  ;;  %s1352_s25 = smov %s1359_s27 }
 0x12f   : >> { %601 = vst [vmem:[%s1067_s15 + $0x40] sm:$0xff] %v600_v54  ;;  %v606_v57 = vld [vmem:[%s1071_s23 + $0x58] sm:$0xff]  ;;  %603 = vst [vmem:[%s1067_s15 + $0x48] sm:$0xff] %v602_v55  ;;  %v608_v58 = vld [vmem:[%s1071_s23 + $0x60] sm:$0xff] }
 0x130   : >> { %605 = vst [vmem:[%s1067_s15 + $0x50] sm:$0xff] %v604_v56  ;;  %607 = vst [vmem:[%s1067_s15 + $0x58] sm:$0xff] %v606_v57  ;;  %s615_s23 = scalar_lea.vmem %s1228_s12, %s613_s28 [#allocation2]  }
 0x131   : >> { %609 = vst [vmem:[%s1067_s15 + $0x60] sm:$0xff] %v608_v58  ;;  %s616_s15 = scalar_lea.vmem %s1263_s22, %s613_s28  }
 0x132 PF: > { %1007 = sdivrem.u32 %s1357_s14, 13 }
 0x133   : > { %s781_s29 = smul.u32 104, %s1269_s20 }
 0x135   : > { %s621_s30 = scalar_lea.vmem %s1228_s12, %s781_s29 [#allocation2]   ;;  %s623_s4 = scalar_lea.vmem %s1263_s22, %s781_s29  }
 0x13b   : > { %s1008_s5 = spop.drf %1007 }
 0x13c   : > { %p783_p13 = scmp.le.s32.totalorder %s1008_s5, 0 }
 0x13d   : > { %s1081_s6 = smov (!%p783_p13), %s623_s4   ;;  %s1085_s7 = smov (!%p783_p13), %s621_s30  }
 0x13e   : > { %714 = sbr.rel (%p783_p13) target bundleno = 331 (0x14b), region = 127  ;;  %s1089_s8 = smov (!%p783_p13), 0  }
 0x13f   : > { %s1093_s9 = smov (!%p783_p13), 0  }
 0x143 LB: >> { %v633_v59 = vld [vmem:[%s1087_s7] sm:$0xff]  ;;  %s635_s10 = sadd.s32 1, %s1091_s8  ;;  %s627_s9 = sadd.s32 1, %s1095_s9   ;;  %s1095_s9 = sphi %s1093_s9, %s627_s9   ;;  %s1091_s8 = sphi %s1089_s8, %s1090_s8   ;;  %s1087_s7 = sphi %s1085_s7, %s640_s7   ;;  %s1083_s6 = sphi %s1081_s6, %s641_s6  }
 0x144   : >> { %634 = vst [vmem:[%s1083_s6] sm:$0xff] %v633_v59  ;;  %p636_p0 = scmp.ge.s32.totalorder %s635_s10, %s1008_s5  ;;  %p626_p1 = scmp.ge.s32.totalorder %s627_s9, %s1008_s5 }
 0x146   : >> { %s1361_s10 = smov (%p636_p0, %s635_s10), 0  ;;  %629 = sbr.rel (!%p626_p1) target bundleno = 323 (0x143), region = 133 }
 0x147   : >> { %s784_s11 = sshll.u32 %s1361_s10, 3  ;;  %s1090_s8 = smov %s1361_s10  }
 0x148   : >> { %s640_s7 = scalar_lea.vmem %s621_s30, %s784_s11 [#allocation2]   ;;  %s641_s6 = scalar_lea.vmem %s623_s4, %s784_s11  }
 0x14b PF: > { %p10_p2 = scmp.ge.s32.totalorder %s1134_s16, 4   ;;  %s1353_s12 = smov %s1059_s13 }
 0x14c   : > { %s1354_s13 = smov %s1142_s19  ;;  %s1355_s14 = smov %s1134_s16 }
 0x14d   :  { %12 = sbr.rel (!%p10_p2) target bundleno = 2 (0x2), region = 144 }

</bundles_post_ra>
